<compile_context>
chip_gen: v7x
topology: tpu7x:2x2x1
jax: 0.10.0
libtpu: 0.0.40
codegen_flags: <defaults>
</compile_context>

<pallas_src>
import functools

import jax
import jax.numpy as jnp
from jax.experimental import pallas as pl
from jax.experimental.pallas import tpu as pltpu


def _round_up(x, m):
    return ((x + m - 1) // m) * m


def _supcon_row_kernel(f_rows_ref, f_all_ref, row_lab_ref, col_lab_ref,
                       inv_pos_ref, out_ref, *, temperature, base_temperature,
                       n_valid):
    """Per row-block SupCon loss.

    f_rows_ref : [TM, D]     bf16  anchor rows of this block
    f_all_ref  : [N_pad, D]  bf16  full contrast features (resident)
    row_lab_ref: [TM, 1]     int32 labels of the anchor rows (-1 for padding)
    col_lab_ref: [1, N_pad]  int32 labels of all contrast rows (-1 for padding)
    inv_pos_ref: [TM, 1]     f32   1 / (positive count per anchor)
    out_ref    : [TM, 1]     f32   per-anchor loss  -(T/bT) * mean_log_prob_pos
    """
    tm = f_rows_ref.shape[0]
    n_pad = f_all_ref.shape[0]

    # Gram block on the MXU: bf16 inputs, f32 accumulation, contraction on the
    # feature axis of both operands (avoids materializing f_all.T).
    logits = jax.lax.dot_general(
        f_rows_ref[...], f_all_ref[...],
        dimension_numbers=(((1,), (1,)), ((), ())),
        preferred_element_type=jnp.float32)
    logits = logits * jnp.float32(1.0 / temperature)

    row_ids = (pl.program_id(0) * tm
               + jax.lax.broadcasted_iota(jnp.int32, (tm, n_pad), 0))
    col_ids = jax.lax.broadcasted_iota(jnp.int32, (tm, n_pad), 1)
    not_self = row_ids != col_ids

    if n_valid < n_pad:
        col_valid = col_ids < n_valid
        # Padded contrast columns must not influence the row max / denominator.
        logits = jnp.where(col_valid, logits, jnp.float32(-1e30))
        logits_mask = col_valid & not_self
    else:
        logits_mask = not_self

    # Row max over the full (real) row, self column included (matches torch.max).
    logits = logits - jnp.max(logits, axis=1, keepdims=True)

    # Softmax denominator over non-self (and non-padded) columns.
    exp_logits = jnp.where(logits_mask, jnp.exp(logits), jnp.float32(0.0))
    denom = jnp.sum(exp_logits, axis=1, keepdims=True) + jnp.float32(1e-6)
    log_denom = jnp.log(denom)                              # only TM logs

    # Positive mask from label equality, built in-registers (never touches HBM).
    pos_mask = (row_lab_ref[...] == col_lab_ref[...]) & logits_mask
    pos_sum = jnp.sum(jnp.where(pos_mask, logits, jnp.float32(0.0)),
                      axis=1, keepdims=True)

    # mean_j mask_ij * (logits_ij - log_denom_i) / cnt_i == pos_sum/cnt - log_denom
    mean_log_prob_pos = pos_sum * inv_pos_ref[...] - log_denom
    out_ref[...] = jnp.float32(-(temperature / base_temperature)) * mean_log_prob_pos


def supcon_loss(features, labels=None, temperature=0.07, base_temperature=0.07,
                block_rows=256):
    """features: [bsz, n_views, ...] -> scalar loss (contrast_mode='all', adv=False).

    block_rows: anchor-row tile. 256 is safe for v7x's 64 MiB VMEM; on v5e/v6e
    (128 MiB VMEM) it can be raised to 512/1024 for large N.
    """
    if features.ndim < 3:
        raise ValueError("`features` needs to be [bsz, n_views, ...]")
    if features.ndim > 3:
        features = features.reshape(features.shape[0], features.shape[1], -1)
    bsz, n_views, d = features.shape
    n = bsz * n_views

    # contrast_feature = cat(unbind(features, dim=1), dim=0): view-major [N, D].
    # bf16 operands for the MXU (accumulation stays f32 inside the kernel).
    cf = jnp.transpose(features, (1, 0, 2)).reshape(n, d).astype(jnp.bfloat16)

    if labels is None:
        labels_eff = jnp.arange(bsz, dtype=jnp.int32)   # eye(bsz) == distinct ids
    else:
        labels_eff = labels.reshape(-1).astype(jnp.int32)
        if labels_eff.shape[0] != bsz:
            raise ValueError("Num of labels does not match num of features")

    # Positives per anchor: (#samples with the same label) * n_views - 1.
    same = labels_eff[:, None] == labels_eff[None, :]
    pos_per_sample = same.sum(axis=1).astype(jnp.float32) * n_views - 1.0
    pos_per_sample = jnp.maximum(pos_per_sample, 1.0)   # guard anchors w/o positives
    lab_rows = jnp.tile(labels_eff, n_views)            # row r <-> sample r % bsz
    inv_pos = 1.0 / jnp.tile(pos_per_sample, n_views)

    assert block_rows % 8 == 0
    tm = min(block_rows, _round_up(n, 8))
    n_pad = _round_up(n, tm)
    num_blocks = n_pad // tm
    d_pad = _round_up(d, 128)            # lane-align the MXU contraction dim

    cf_p = jnp.pad(cf, ((0, n_pad - n), (0, d_pad - d)))
    lab_p = jnp.pad(lab_rows, (0, n_pad - n), constant_values=-1)
    inv_pos_p = jnp.pad(inv_pos, (0, n_pad - n)).astype(jnp.float32)

    row_lab = lab_p.reshape(n_pad, 1)
    col_lab = lab_p.reshape(1, n_pad)
    inv_pos_col = inv_pos_p.reshape(n_pad, 1)

    kernel = functools.partial(
        _supcon_row_kernel,
        temperature=float(temperature),
        base_temperature=float(base_temperature),
        n_valid=n)

    # Explicit VMEM budget (resident contrast block + double-buffered row tiles
    # + ~4 live [TM, N_pad] f32 temporaries), capped at 64 MiB for v7x safety.
    vmem_est = (n_pad * d_pad * 2          # resident contrast features (bf16)
                + 2 * tm * d_pad * 2       # double-buffered row block
                + 4 * (n_pad + tm) + 4 * tm
                + 4 * tm * n_pad * 4       # [TM, N_pad] f32 temporaries
                + 2 * tm * 4)
    vmem_limit = int(max(32 * 1024 * 1024, min(64 * 1024 * 1024, 2 * vmem_est)))

    row_loss = pl.pallas_call(
        kernel,
        out_shape=jax.ShapeDtypeStruct((n_pad, 1), jnp.float32),
        grid=(num_blocks,),
        in_specs=[
            pl.BlockSpec((tm, d_pad), lambda i: (i, 0)),      # anchor row block
            pl.BlockSpec((n_pad, d_pad), lambda i: (0, 0)),   # full contrast (resident)
            pl.BlockSpec((tm, 1), lambda i: (i, 0)),          # row labels
            pl.BlockSpec((1, n_pad), lambda i: (0, 0)),       # col labels (resident)
            pl.BlockSpec((tm, 1), lambda i: (i, 0)),          # 1 / positive count
        ],
        out_specs=pl.BlockSpec((tm, 1), lambda i: (i, 0)),
        compiler_params=pltpu.CompilerParams(
            dimension_semantics=("parallel",),
            vmem_limit_bytes=vmem_limit),
    )(cf_p, cf_p, row_lab, col_lab, inv_pos_col)

    # Final reduction over N scalars (trivial glue): mean over all anchors.
    return jnp.mean(row_loss[:n, 0])


def _supcon_loss_ref(features, labels=None, temperature=0.07, base_temperature=0.07):
    """Pure-JAX reference mirroring the PyTorch module (contrast_mode='all',
    adv=False) with the same precision/formula choices as the kernel:
    bf16 Gram operands and the canonical logits - log(denom) log-prob."""
    if features.ndim > 3:
        features = features.reshape(features.shape[0], features.shape[1], -1)
    bsz, n_views, d = features.shape
    n = bsz * n_views
    cf = jnp.transpose(features, (1, 0, 2)).reshape(n, d)
    cf = cf.astype(jnp.bfloat16).astype(jnp.float32)
    if labels is None:
        base = jnp.eye(bsz, dtype=jnp.float32)
    else:
        labels = labels.reshape(-1, 1)
        base = (labels == labels.T).astype(jnp.float32)
    logits = (cf @ cf.T) / temperature
    logits = logits - jnp.max(logits, axis=1, keepdims=True)
    lmask = 1.0 - jnp.eye(n, dtype=jnp.float32)
    mask = jnp.tile(base, (n_views, n_views)) * lmask
    exp_logits = jnp.exp(logits) * lmask
    denom = exp_logits.sum(axis=1, keepdims=True) + 1e-6
    log_prob = logits - jnp.log(denom)
    mlpp = (mask * log_prob).sum(axis=1) / jnp.maximum(mask.sum(axis=1), 1.0)
    loss = -(temperature / base_temperature) * mlpp
    return loss.reshape(n_views, bsz).mean()


if __name__ == "__main__":
    key = jax.random.PRNGKey(0)
    k1, k2, k3, k4 = jax.random.split(key, 4)

    # Case 1: small, single row-block (bsz=8, n_views=2, feat_dim=32 -> N=16).
    bsz, n_views, feat_dim = 8, 2, 32
    feats = jax.random.normal(k1, (bsz, n_views, feat_dim), dtype=jnp.float32)
    feats = feats / jnp.linalg.norm(feats, axis=-1, keepdims=True)
    labels = jax.random.randint(k2, (bsz,), 0, 3)

    loss_unsup = supcon_loss(feats)                     # SimCLR path
    loss_sup = supcon_loss(feats, labels=labels)        # supervised path
    jax.block_until_ready((loss_unsup, loss_sup))

    ref_unsup = _supcon_loss_ref(feats)
    ref_sup = _supcon_loss_ref(feats, labels=labels)
    assert jnp.allclose(loss_unsup, ref_unsup, atol=1e-3, rtol=1e-3), (
        loss_unsup, ref_unsup)
    assert jnp.allclose(loss_sup, ref_sup, atol=1e-3, rtol=1e-3), (
        loss_sup, ref_sup)

    # Case 2: exercises row tiling + padding (N=100 -> padded to 128, two blocks).
    bsz2, n_views2, feat_dim2 = 50, 2, 32
    feats2 = jax.random.normal(k3, (bsz2, n_views2, feat_dim2), dtype=jnp.float32)
    feats2 = feats2 / jnp.linalg.norm(feats2, axis=-1, keepdims=True)
    labels2 = jax.random.randint(k4, (bsz2,), 0, 5)

    loss2 = supcon_loss(feats2, labels=labels2, block_rows=64)
    jax.block_until_ready(loss2)
    ref2 = _supcon_loss_ref(feats2, labels=labels2)
    assert jnp.allclose(loss2, ref2, atol=1e-3, rtol=1e-3), (loss2, ref2)

    print("KERNEL_OK")
</pallas_src>

<mosaic_0001>
module attributes {stable_mosaic.version = 11 : i64} {
  func.func @_supcon_row_kernel(%arg0: i32, %arg1: memref<16x128xbf16, #tpu.memory_space<vmem>>, %arg2: memref<16x128xbf16, #tpu.memory_space<vmem>>, %arg3: memref<16x1xi32, #tpu.memory_space<vmem>>, %arg4: memref<1x16xi32, #tpu.memory_space<vmem>>, %arg5: memref<16x1xf32, #tpu.memory_space<vmem>>, %arg6: memref<16x1xf32, #tpu.memory_space<vmem>>) attributes {dimension_semantics = [#tpu.dimension_semantics<parallel>], iteration_bounds = array<i64: 1>, scalar_prefetch = 0 : i64, scratch_operands = 0 : i64, tpu.core_type = #tpu.core_type<tc>, window_params = [{transform_indices = @transform_0, window_bounds = array<i64: 16, 128>}, {pipeline_mode = #tpu.pipeline_mode<synchronous>, transform_indices = @transform_1, window_bounds = array<i64: 16, 128>}, {transform_indices = @transform_2, window_bounds = array<i64: 16, 1>}, {pipeline_mode = #tpu.pipeline_mode<synchronous>, transform_indices = @transform_3, window_bounds = array<i64: 1, 16>}, {transform_indices = @transform_4, window_bounds = array<i64: 16, 1>}, {transform_indices = @transform_5, window_bounds = array<i64: 16, 1>}]} {
    %c0 = arith.constant 0 : index
    %c0_0 = arith.constant 0 : index
    %0 = vector.load %arg1[%c0, %c0_0] : memref<16x128xbf16, #tpu.memory_space<vmem>>, vector<16x128xbf16>
    %c0_1 = arith.constant 0 : index
    %c0_2 = arith.constant 0 : index
    %1 = vector.load %arg2[%c0_1, %c0_2] : memref<16x128xbf16, #tpu.memory_space<vmem>>, vector<16x128xbf16>
    %cst = arith.constant dense<0.000000e+00> : vector<16x16xf32>
    %2 = tpu.matmul %0, %1, %cst {dimension_numbers = #tpu.dot_dimension_numbers<[1], [1], [0], [0], [0, 0, 1, 0], [], []>} : vector<16x128xbf16>, vector<16x128xbf16>, vector<16x16xf32> -> vector<16x16xf32>
    %cst_3 = arith.constant 14.2857141 : f32
    %3 = vector.broadcast %cst_3 : f32 to vector<16x16xf32>
    %4 = arith.mulf %2, %3 : vector<16x16xf32>
    %c16_i32 = arith.constant 16 : i32
    %5 = arith.muli %arg0, %c16_i32 : i32
    %6 = tpu.iota {dimensions = array<i32: 0>} : vector<16x16xi32>
    %7 = vector.broadcast %5 : i32 to vector<16x16xi32>
    %8 = arith.addi %7, %6 : vector<16x16xi32>
    %9 = tpu.iota {dimensions = array<i32: 1>} : vector<16x16xi32>
    %10 = arith.cmpi ne, %8, %9 : vector<16x16xi32>
    %cst_4 = arith.constant dense<0xFF800000> : vector<16xf32>
    %11 = vector.multi_reduction <maximumf>, %4, %cst_4 [1] : vector<16x16xf32> to vector<16xf32>
    %12 = vector.shape_cast %11 : vector<16xf32> to vector<16x1xf32>
    %13 = vector.broadcast %12 : vector<16x1xf32> to vector<16x16xf32>
    %14 = arith.subf %4, %13 : vector<16x16xf32>
    %15 = math.exp %14 : vector<16x16xf32>
    %cst_5 = arith.constant 0.000000e+00 : f32
    %16 = vector.broadcast %cst_5 : f32 to vector<16x16xf32>
    %17 = arith.select %10, %15, %16 : vector<16x16xi1>, vector<16x16xf32>
    %cst_6 = arith.constant dense<0.000000e+00> : vector<16xf32>
    %18 = vector.multi_reduction <add>, %17, %cst_6 [1] : vector<16x16xf32> to vector<16xf32>
    %19 = vector.shape_cast %18 : vector<16xf32> to vector<16x1xf32>
    %cst_7 = arith.constant 9.99999997E-7 : f32
    %20 = vector.broadcast %cst_7 : f32 to vector<16x1xf32>
    %21 = arith.addf %19, %20 : vector<16x1xf32>
    %22 = math.log %21 : vector<16x1xf32>
    %c0_8 = arith.constant 0 : index
    %c0_9 = arith.constant 0 : index
    %23 = vector.load %arg3[%c0_8, %c0_9] : memref<16x1xi32, #tpu.memory_space<vmem>>, vector<16x1xi32>
    %c0_10 = arith.constant 0 : index
    %c0_11 = arith.constant 0 : index
    %24 = vector.load %arg4[%c0_10, %c0_11] : memref<1x16xi32, #tpu.memory_space<vmem>>, vector<1x16xi32>
    %25 = vector.broadcast %23 : vector<16x1xi32> to vector<16x16xi32>
    %26 = vector.broadcast %24 : vector<1x16xi32> to vector<16x16xi32>
    %27 = arith.cmpi eq, %25, %26 : vector<16x16xi32>
    %28 = arith.andi %27, %10 : vector<16x16xi1>
    %cst_12 = arith.constant 0.000000e+00 : f32
    %29 = vector.broadcast %cst_12 : f32 to vector<16x16xf32>
    %30 = arith.select %28, %14, %29 : vector<16x16xi1>, vector<16x16xf32>
    %cst_13 = arith.constant dense<0.000000e+00> : vector<16xf32>
    %31 = vector.multi_reduction <add>, %30, %cst_13 [1] : vector<16x16xf32> to vector<16xf32>
    %32 = vector.shape_cast %31 : vector<16xf32> to vector<16x1xf32>
    %c0_14 = arith.constant 0 : index
    %c0_15 = arith.constant 0 : index
    %33 = vector.load %arg5[%c0_14, %c0_15] : memref<16x1xf32, #tpu.memory_space<vmem>>, vector<16x1xf32>
    %34 = arith.mulf %32, %33 : vector<16x1xf32>
    %35 = arith.subf %34, %22 : vector<16x1xf32>
    %cst_16 = arith.constant -1.000000e+00 : f32
    %36 = vector.broadcast %cst_16 : f32 to vector<16x1xf32>
    %37 = arith.mulf %36, %35 : vector<16x1xf32>
    %c0_17 = arith.constant 0 : index
    %c0_18 = arith.constant 0 : index
    %38 = vector.load %arg6[%c0_17, %c0_18] : memref<16x1xf32, #tpu.memory_space<vmem>>, vector<16x1xf32>
    tpu.vector_store %arg6[%c0_17, %c0_18], %37 {strides = array<i32>} : memref<16x1xf32, #tpu.memory_space<vmem>>, vector<16x1xf32>,
    return
  }
  func.func @transform_0(%arg0: i32) -> (i32, i32) {
    %c0_i32 = arith.constant 0 : i32
    %c0_i32_0 = arith.constant 0 : i32
    return %arg0, %c0_i32 : i32, i32
  }
  func.func @transform_1(%arg0: i32) -> (i32, i32) {
    %c0_i32 = arith.constant 0 : i32
    %c0_i32_0 = arith.constant 0 : i32
    %c0_i32_1 = arith.constant 0 : i32
    return %c0_i32, %c0_i32_0 : i32, i32
  }
  func.func @transform_2(%arg0: i32) -> (i32, i32) {
    %c0_i32 = arith.constant 0 : i32
    %c0_i32_0 = arith.constant 0 : i32
    return %arg0, %c0_i32 : i32, i32
  }
  func.func @transform_3(%arg0: i32) -> (i32, i32) {
    %c0_i32 = arith.constant 0 : i32
    %c0_i32_0 = arith.constant 0 : i32
    %c0_i32_1 = arith.constant 0 : i32
    return %c0_i32, %c0_i32_0 : i32, i32
  }
  func.func @transform_4(%arg0: i32) -> (i32, i32) {
    %c0_i32 = arith.constant 0 : i32
    %c0_i32_0 = arith.constant 0 : i32
    return %arg0, %c0_i32 : i32, i32
  }
  func.func @transform_5(%arg0: i32) -> (i32, i32) {
    %c0_i32 = arith.constant 0 : i32
    %c0_i32_0 = arith.constant 0 : i32
    return %arg0, %c0_i32 : i32, i32
  }
}

</mosaic_0001>

<bundles_post_ra>
// kernel: tpu_custom_call.1
= control target key start
LH: loop header
LB: loop body
LE: loop exit
PB: predicated region body
PF: predicated region fallthrough
CT: control target
= control target key end

     0   :  { %v184_v0 = vmov 0.0   ;;  %vm185_vm0 = vmmov 0   ;;  %v186_v3 = vmov 0   ;;  %vm91_vm1 = vcmask 130048   ;;  %s250_s1 = inlined_call_operand.vmem [shape: bf16[16,128], index: 1, kind: input, shape index: {}]   ;;  %s251_s0 = inlined_call_operand.vmem [shape: bf16[16,128], index: 0, kind: input, shape index: {}]   ;;  %s252_s2 = inlined_call_operand.vmem [shape: s32[16,1], index: 2, kind: input, shape index: {}]   ;;  %s253_s3 = inlined_call_operand.vmem [shape: s32[1,16], index: 3, kind: input, shape index: {}]   ;;  %s254_s4 = inlined_call_operand.vmem [shape: f32[16,1], index: 4, kind: input, shape index: {}]   ;;  %s255_s5 = inlined_call_operand.vmem [shape: f32[16,1], index: 5, kind: output, shape index: {}]  }
   0x1   :  { %163 = vmatprep.subr.bf16.mxu0 %v184_v0  ;;  %v174_v1 = vld [vmem:[%s250_s1] sm:$0xff]   ;;  %165 = vmatprep.mubr.msk.bf16.mxu0 %vm185_vm0, %v184_v0  ;;  %v119_v5 = vld [vmem:[%s252_s2 + $0x8] sm:$0xff]  ;;  %v81_v17 = vlaneseq  ;;  %vm151_vm8 = vcmask 7168  }
   0x2   :  { %164 = vmatpush3.bf16.xpose.msra.mxu0 %v174_v1  ;;  %v175_v2 = vld [vmem:[%s251_s0] sm:$0xff]   ;;  %172 = vset.pattern.permute.xlu1 %v186_v3  ;;  %v144_v46 = vld [vmem:[%s254_s4 + $0x8] sm:$0xff] }
   0x3   :  { %v118_v4 = vld [vmem:[%s252_s2] sm:$0xff]  ;;  %173 = vset.pattern.permute.xlu0 %v186_v3  ;;  %v82_v22 = vshrl.u32 %v81_v17, 7  ;;  %v88_v23 = vand.u32 127, %v81_v17 }
   0x4   :  { %122 = vperm.xlu1 %172, %v118_v4   ;;  %v160_v24 = vld [vmem:[%s253_s3] ss:$0 sm:$0xff] }
   0x5   :  { %vm89_vm2 = vcmp.ne.s32.totalorder %v82_v22, %v88_v23  ;;  %v83_v25 = vadd.s32 8, %v82_v22  ;;  %v143_v42 = vld [vmem:[%s254_s4] sm:$0xff] }
   0x7   :  { %vm90_vm5 = vcmp.ne.s32.totalorder %v83_v25, %v88_v23 }
   0x8   :  { %125 = vperm.xlu1 %172, %v119_v5  }
   0x9   :  { %166 = vmatmul.mubr.bf16.vlgmr.msra.gmra.mrb[0].mxu0 %v175_v2 }
  0x83   :  { %v123_v20 = vpop.permute.xlu1 %122 }
  0x84   :  { %vm131_vm3 = vcmp.eq.s32.totalorder %v123_v20, %v160_v24 }
  0x85   :  { %vm133_vm4 = vmand %vm131_vm3, %vm89_vm2 }
  0x87   :  { %v126_v26 = vpop.permute.xlu1 %125 }
  0x88   :  { %vm132_vm6 = vcmp.eq.s32.totalorder %v126_v26, %v160_v24 }
  0x89   :  { %vm134_vm7 = vmand %vm132_vm6, %vm90_vm5 }
  0xdc   :  { %v71_v6 = vpop.f32.mrb[0].mxu0 }
  0xdd   :  { %v78_v7 = vmul.f32 14.285714, %v71_v6  ;;  %v167_v8 = vpop.f32.mrb[1].mxu0 }
  0xde   :  { %v74_v9 = vpop.f32.mrb[2].mxu0 }
  0xdf   :  { %v79_v10 = vmul.f32 14.285714, %v74_v9  ;;  %v168_v11 = vpop.f32.mrb[3].mxu0  ;;  %v92_v12 = vsel %vm91_vm1, %v78_v7, -inf }
  0xe0   :  { %93 = vmax.xlane.f32.xlu0 %v92_v12 }
  0xe1   :  { %v95_v13 = vsel %vm91_vm1, %v79_v10, -inf }
  0xe4   :  { %96 = vmax.xlane.f32.xlu0 %v95_v13 }
 0x16d   :  { %v94_v14 = vpop.xlane.xlu0 %93 }
 0x16e   :  { %v98_v15 = vsub.f32 %v78_v7, %v94_v14 }
 0x170   :  { %v100_v16 = vmul.f32 1.442695, %v98_v15  ;;  %v135_v30 = vsel %vm133_vm4, %v98_v15, 0.0 }
 0x171   :  { %v97_v18 = vpop.xlane.xlu0 %96  ;;  %v137_v33 = vsel %vm91_vm1, %v135_v30, 0.0 }
 0x172   :  { %176 = vpow2.f32 %v100_v16  ;;  %v99_v19 = vsub.f32 %v79_v10, %v97_v18 }
 0x174   :  { %v102_v21 = vmul.f32 1.442695, %v99_v19  ;;  %v136_v35 = vsel %vm134_vm7, %v99_v19, 0.0 }
 0x175   :  { %v140_v36 = vsel %vm91_vm1, %v136_v35, 0.0 }
 0x176   :  { %178 = vpow2.f32 %v102_v21 }
 0x17c   :  { %v177_v27 = vpop.eup %176 }
 0x17d   :  { %v104_v28 = vsel %vm89_vm2, %v177_v27, 0.0 }
 0x17e   :  { %v106_v29 = vsel %vm91_vm1, %v104_v28, 0.0 }
 0x17f   :  { %107 = vadd.xlane.f32.xlu0 %v106_v29 }
 0x180   :  { %v179_v31 = vpop.eup %178 }
 0x181   :  { %v105_v32 = vsel %vm90_vm5, %v179_v31, 0.0 }
 0x182   :  { %v109_v34 = vsel %vm91_vm1, %v105_v32, 0.0 }
 0x183   :  { %138 = vadd.xlane.f32.xlu0 %v137_v33  ;;  %110 = vadd.xlane.f32.xlu1 %v109_v34 }
 0x187   :  { %141 = vadd.xlane.f32.xlu0 %v140_v36 }
 0x20c   :  { %v108_v37 = vpop.xlane.xlu0 %107 }
 0x20d   :  { %v112_v38 = vadd.f32 1e-06, %v108_v37 }
 0x20f   :  { %180 = vlog2.f32 %v112_v38 }
 0x210   :  { %v111_v39 = vpop.xlane.xlu1 %110  ;;  %v139_v41 = vpop.xlane.xlu0 %138 }
 0x211   :  { %v113_v40 = vadd.f32 1e-06, %v111_v39  ;;  %v145_v45 = vmul.f32 %v143_v42, %v139_v41 }
 0x213   :  { %182 = vlog2.f32 %v113_v40 }
 0x214   :  { %v142_v47 = vpop.xlane.xlu0 %141 }
 0x215   :  { %v146_v52 = vmul.f32 %v144_v46, %v142_v47 }
 0x219   :  { %v181_v43 = vpop.eup %180 }
 0x21a   :  { %v115_v44 = vmul.f32 0.6931472, %v181_v43 }
 0x21c   :  { %v147_v48 = vsub.f32 %v145_v45, %v115_v44 }
 0x21d   :  { %v183_v49 = vpop.eup %182 }
 0x21e   :  { %v117_v50 = vmul.f32 0.6931472, %v183_v49  ;;  %v149_v51 = vmul.f32 -1.0, %v147_v48 }
 0x220   :  { %152 = vst.msk [vmem:[%s255_s5] sm:$0xff] %vm151_vm8, %v149_v51  ;;  %v148_v53 = vsub.f32 %v146_v52, %v117_v50 }
 0x222   :  { %v150_v54 = vmul.f32 -1.0, %v148_v53 }
 0x224   :  { %153 = vst.msk [vmem:[%s255_s5 + $0x8] sm:$0xff] %vm151_vm8, %v150_v54 }

</bundles_post_ra>
